<compile_context>
chip_gen: v7x
topology: tpu7x:2x2x1
jax: 0.10.0
libtpu: 0.0.40
codegen_flags: <defaults>
</compile_context>

<pallas_src>
import jax
import jax.numpy as jnp
from jax.experimental import pallas as pl
from jax.experimental.pallas import tpu as pltpu

EPS = 1e-12  # F.normalize default eps


def _cdiv(a, b):
    return (a + b - 1) // b


def _round_up(a, m):
    return _cdiv(a, m) * m


def _vmem_capacity_bytes():
    """Physical VMEM of the local TPU generation (fallback: 64 MiB = v7x per-TC)."""
    try:
        info = pltpu.get_tpu_info()
        for attr in ("vmem_capacity_bytes", "vmem_bytes", "vmem_size_bytes"):
            v = getattr(info, attr, None)
            if v:
                return int(v)
    except Exception:
        pass
    return 64 << 20


# -----------------------------------------------------------------------------
# Pallas kernel: per-sample, per-class normalized-inner-product square loss.
# Processes Bb samples per grid step.
# -----------------------------------------------------------------------------
def _square_loss_kernel(y_ref, h0_ref, h1_ref, h2_ref, h3_ref, t_ref, o_ref):
    # y_ref : (Bb, 4, C)  selected per-class pixel vectors (un-normalized, bf16/f32)
    # hk_ref: (Bb, C, S)  class-k feature map, spatial flattened onto lanes
    # t_ref : (Bb, S)     targets2 (int32)
    # o_ref : (Bb, 4)     per-sample per-class mean squared loss (f32)
    S = t_ref.shape[-1]
    inv_s = 1.0 / float(S)

    y = y_ref[...].astype(jnp.float32)                       # (Bb, 4, C)
    t = t_ref[...]                                           # (Bb, S) int32

    # 1 / max(||y||, eps) per (sample, class); eps clamp folded as eps^2 under rsqrt.
    inv_ny = jax.lax.rsqrt(jnp.maximum(jnp.sum(y * y, axis=-1), EPS * EPS))  # (Bb, 4)

    parts = []
    for k, h_ref in enumerate((h0_ref, h1_ref, h2_ref, h3_ref)):
        # 4 classes, statically unrolled; every op is vectorized over (Bb, S).
        hk = h_ref[...].astype(jnp.float32)                  # (Bb, C, S)
        yk = y[:, k, :]                                      # (Bb, C)

        # channel inner product and per-pixel channel norm of h (F.normalize(dim=1))
        dot = jnp.sum(yk[:, :, None] * hk, axis=1)           # (Bb, S) sublane reduce
        inv_nh = jax.lax.rsqrt(
            jnp.maximum(jnp.sum(hk * hk, axis=1), EPS * EPS))  # (Bb, S)

        inner = dot * (inv_ny[:, k:k + 1] * inv_nh)          # cosine term (Bb, S)
        mapk = 2.0 * (t == k).astype(jnp.float32) - 1.0      # {-1,+1} target map
        diff = inner - mapk
        # spatial mean folded into a single scale
        parts.append(jnp.sum(diff * diff, axis=-1, keepdims=True) * inv_s)  # (Bb, 1)

    # single fused store (avoids 4 masked partial-column stores on a 4-lane output)
    o_ref[...] = jnp.concatenate(parts, axis=-1)             # (Bb, 4)


def square_loss_maps(y_vecs, h0, h1, h2, h3, targets2_flat, *,
                     block_b=None, h_buffers=2):
    """y_vecs: (b,4,C), h0..h3: (b,C,S), targets2_flat: (b,S) int32.
    Returns per-sample per-class losses, shape (b, 4) float32."""
    b, _, C = y_vecs.shape
    S = h0.shape[-1]
    h_item = jnp.dtype(h0.dtype).itemsize
    y_item = jnp.dtype(y_vecs.dtype).itemsize

    # ---- batch block Bb from an explicit VMEM budget --------------------------
    phys = _vmem_capacity_bytes()
    budget = int(phys * 0.45)          # leave headroom for compiler scratch etc.
    per_sample = (h_buffers * (4 * C * S * h_item)   # four class maps, h_buffers-deep
                  + 2 * (4 * C * y_item)             # y vectors, double-buffered
                  + 2 * (S * 4)                      # targets2 (int32)
                  + 2 * (4 * 4))                     # f32 output
    bb_cap = max(budget // max(per_sample, 1), 1)
    if block_b is not None:
        bb_cap = min(bb_cap, int(block_b))

    if bb_cap >= b and b <= 8:
        Bb = b                                        # tiny batch: one full block
    elif bb_cap >= b:
        # Whole batch would fit, but keep >=2 (>=4 for large b) grid steps so the
        # "parallel" batch axis can shard across TensorCores (v7x) and the
        # pipeline has a next block to prefetch.
        steps = 4 if b >= 32 else 2
        Bb = min(b, max(8, _round_up(_cdiv(b, steps), 8)))
    else:
        # VMEM-limited: largest 8-aligned block within budget.
        Bb = min(b, max(8, (bb_cap // 8) * 8))
        # TODO(synk): if one sample's maps alone exceed the budget (huge C*S), the
        # spatial axis would also need a grid dimension; not needed at these sizes.

    grid_n = pl.cdiv(b, Bb)            # no jnp.pad: tail-block OOB rows are sliced off
    needed = Bb * per_sample
    vmem_limit = int(min(0.9 * phys, max(needed + (4 << 20), 32 << 20)))

    h_idx = lambda i: (i, 0, 0)
    if h_buffers == 2:
        h_spec = pl.BlockSpec((Bb, C, S), h_idx)
    else:
        h_spec = pl.BlockSpec((Bb, C, S), h_idx, pipeline_mode=pl.Buffered(h_buffers))

    out = pl.pallas_call(
        _square_loss_kernel,
        out_shape=jax.ShapeDtypeStruct((grid_n * Bb if grid_n * Bb == b else b, 4),
                                       jnp.float32) if False else
                  jax.ShapeDtypeStruct((b, 4), jnp.float32),
        grid=(grid_n,),
        in_specs=[
            pl.BlockSpec((Bb, 4, C), lambda i: (i, 0, 0)),
            h_spec, h_spec, h_spec, h_spec,
            pl.BlockSpec((Bb, S), lambda i: (i, 0)),
        ],
        out_specs=pl.BlockSpec((Bb, 4), lambda i: (i, 0)),
        compiler_params=pltpu.CompilerParams(
            dimension_semantics=("parallel",),
            vmem_limit_bytes=vmem_limit),
    )(y_vecs, h0, h1, h2, h3, targets2_flat)
    return out[:b]


# -----------------------------------------------------------------------------
# Glue: random pixel selection per (sample, class), mirroring the torch gather
#   a_k = h_k.permute(1,2,0)[targets1 == k]; y_k = a_k[randint(len(a_k))].
# Fully vmapped over (batch, class) — no Python double loop.
# -----------------------------------------------------------------------------
def select_random_pixels(bh_list, targets1, key):
    b, c, h, w = bh_list[0].shape
    S = h * w
    feats = jnp.stack(bh_list, axis=1).reshape(b, 4, c, S)      # (b, 4, c, S)
    tflat = targets1.reshape(b, S)
    keys = jax.random.split(key, b * 4)
    keys = keys.reshape((b, 4) + keys.shape[1:])

    def pick_one(feat_cs, t_row, k, kk):
        mask = (t_row == k)                                     # (S,)
        count = jnp.sum(mask.astype(jnp.int32))
        j = jax.random.randint(kk, (), 0, jnp.maximum(count, 1))
        pos = jnp.argmax(jnp.cumsum(mask.astype(jnp.int32)) > j)   # (j+1)-th True index
        vec = feat_cs[:, pos]                                   # (c,)
        empty = (count == 0)
        vec = jnp.where(empty, jnp.zeros_like(vec), vec)        # a_k.new_zeros([1,c])
        return vec, empty

    classes = jnp.arange(4, dtype=jnp.int32)
    pick_classes = jax.vmap(pick_one, in_axes=(0, None, 0, 0))   # over the 4 classes
    pick_batch = jax.vmap(pick_classes, in_axes=(0, 0, None, 0)) # over the batch
    y_vecs, flags = pick_batch(feats, tflat.astype(jnp.int32), classes, keys)
    return y_vecs, flags                                        # (b, 4, c), (b, 4)


def square_loss_forward(bh_0, bh_1, bh_2, bh_3, btargets1, y,
                        bh_00, bh_11, bh_22, bh_33, btargets2, yy,
                        *, key, feature_dtype=jnp.bfloat16):
    # y, yy are unused by the reference forward.
    del y, yy
    b, c, _, _ = bh_0.shape
    bb, cc, hh, ww = bh_00.shape
    S = hh * ww

    y_vecs, errorflags = select_random_pixels([bh_0, bh_1, bh_2, bh_3], btargets1, key)

    # Feature maps feed the bandwidth-bound kernel in bf16 (halves HBM traffic);
    # all reductions are upcast to f32 inside the kernel.  In production the
    # upstream layer should emit bf16 directly so these casts are no-ops.
    fd = feature_dtype
    h00 = bh_00.reshape(b, cc, S).astype(fd)
    h11 = bh_11.reshape(b, cc, S).astype(fd)
    h22 = bh_22.reshape(b, cc, S).astype(fd)
    h33 = bh_33.reshape(b, cc, S).astype(fd)
    yv = y_vecs.astype(fd)
    t2 = btargets2.reshape(b, S).astype(jnp.int32)

    per = square_loss_maps(yv, h00, h11, h22, h33, t2)           # (b, 4)
    per = per * (1.0 - errorflags.astype(jnp.float32))           # zero-out empty classes

    loss0 = jnp.sum(per[:, 0]) / b
    loss1 = jnp.sum(per[:, 1]) / b
    loss2 = jnp.sum(per[:, 2]) / b
    loss3 = jnp.sum(per[:, 3]) / b
    loss4 = jnp.sum(jnp.sum(per, axis=1) / 4.0) / b
    return loss0, loss1, loss2, loss3, loss4


# Pure-JAX reference of the kernel math (same selected vectors) for sanity check.
def _ref_per_class(y_vecs, h_maps, t2):
    yn = y_vecs / jnp.maximum(jnp.linalg.norm(y_vecs, axis=-1, keepdims=True), EPS)
    hn = h_maps / jnp.maximum(jnp.linalg.norm(h_maps, axis=2, keepdims=True), EPS)
    inner = jnp.einsum('bkc,bkcs->bks', yn, hn)
    mapk = 2.0 * (t2[:, None, :] == jnp.arange(4)[None, :, None]).astype(jnp.float32) - 1.0
    return jnp.mean((inner - mapk) ** 2, axis=-1)                # (b, 4)


if __name__ == "__main__":
    root = jax.random.PRNGKey(0)
    ks = jax.random.split(root, 13)

    b, c, h, w = 2, 16, 16, 16       # first feature set (NCHW)
    hh, ww = 8, 8                    # second feature set (NCHW)

    bh_0 = jax.random.normal(ks[0], (b, c, h, w), jnp.float32)
    bh_1 = jax.random.normal(ks[1], (b, c, h, w), jnp.float32)
    bh_2 = jax.random.normal(ks[2], (b, c, h, w), jnp.float32)
    bh_3 = jax.random.normal(ks[3], (b, c, h, w), jnp.float32)
    btargets1 = jax.random.randint(ks[4], (b, h, w), 0, 4)

    bh_00 = jax.random.normal(ks[5], (b, c, hh, ww), jnp.float32)
    bh_11 = jax.random.normal(ks[6], (b, c, hh, ww), jnp.float32)
    bh_22 = jax.random.normal(ks[7], (b, c, hh, ww), jnp.float32)
    bh_33 = jax.random.normal(ks[8], (b, c, hh, ww), jnp.float32)
    btargets2 = jax.random.randint(ks[9], (b, hh, ww), 0, 4)

    y_dummy = jnp.zeros((b,), jnp.float32)    # unused by the reference forward
    yy_dummy = jnp.zeros((b,), jnp.float32)   # unused by the reference forward

    losses = square_loss_forward(bh_0, bh_1, bh_2, bh_3, btargets1, y_dummy,
                                 bh_00, bh_11, bh_22, bh_33, btargets2, yy_dummy,
                                 key=ks[10])
    losses = tuple(jax.block_until_ready(l) for l in losses)

    # Sanity check: kernel math vs a pure-JAX reference that uses the exact same
    # (bf16-rounded) inputs and the same randomly-selected vectors.
    y_vecs, flags = select_random_pixels([bh_0, bh_1, bh_2, bh_3], btargets1, ks[10])
    S = hh * ww
    fd = jnp.bfloat16
    h_list = [bh_00.reshape(b, c, S).astype(fd), bh_11.reshape(b, c, S).astype(fd),
              bh_22.reshape(b, c, S).astype(fd), bh_33.reshape(b, c, S).astype(fd)]
    t2 = btargets2.reshape(b, S).astype(jnp.int32)
    kernel_per = square_loss_maps(y_vecs.astype(fd), *h_list, t2)
    h_maps = jnp.stack([hm.astype(jnp.float32) for hm in h_list], axis=1)   # (b,4,c,S)
    ref_per = _ref_per_class(y_vecs.astype(fd).astype(jnp.float32), h_maps, t2)
    assert jnp.allclose(kernel_per, ref_per, atol=1e-4, rtol=1e-4), (kernel_per, ref_per)

    print("KERNEL_OK")
</pallas_src>

<mosaic_0001>
module attributes {stable_mosaic.version = 11 : i64} {
  func.func @_square_loss_kernel(%arg0: i32, %arg1: memref<2x4x16xbf16, #tpu.memory_space<vmem>>, %arg2: memref<2x16x64xbf16, #tpu.memory_space<vmem>>, %arg3: memref<2x16x64xbf16, #tpu.memory_space<vmem>>, %arg4: memref<2x16x64xbf16, #tpu.memory_space<vmem>>, %arg5: memref<2x16x64xbf16, #tpu.memory_space<vmem>>, %arg6: memref<2x64xi32, #tpu.memory_space<vmem>>, %arg7: memref<2x4xf32, #tpu.memory_space<vmem>>) attributes {dimension_semantics = [#tpu.dimension_semantics<parallel>], iteration_bounds = array<i64: 1>, scalar_prefetch = 0 : i64, scratch_operands = 0 : i64, tpu.core_type = #tpu.core_type<tc>, window_params = [{transform_indices = @transform_0, window_bounds = array<i64: 2, 4, 16>}, {transform_indices = @transform_1, window_bounds = array<i64: 2, 16, 64>}, {transform_indices = @transform_2, window_bounds = array<i64: 2, 16, 64>}, {transform_indices = @transform_3, window_bounds = array<i64: 2, 16, 64>}, {transform_indices = @transform_4, window_bounds = array<i64: 2, 16, 64>}, {transform_indices = @transform_5, window_bounds = array<i64: 2, 64>}, {transform_indices = @transform_6, window_bounds = array<i64: 2, 4>}]} {
    %c0 = arith.constant 0 : index
    %c0_0 = arith.constant 0 : index
    %c0_1 = arith.constant 0 : index
    %0 = vector.load %arg1[%c0, %c0_0, %c0_1] : memref<2x4x16xbf16, #tpu.memory_space<vmem>>, vector<2x4x16xbf16>
    %1 = arith.extf %0 : vector<2x4x16xbf16> to vector<2x4x16xf32>
    %c0_2 = arith.constant 0 : index
    %c0_3 = arith.constant 0 : index
    %2 = vector.load %arg6[%c0_2, %c0_3] : memref<2x64xi32, #tpu.memory_space<vmem>>, vector<2x64xi32>
    %3 = arith.mulf %1, %1 : vector<2x4x16xf32>
    %cst = arith.constant dense<0.000000e+00> : vector<2x4xf32>
    %4 = vector.multi_reduction <add>, %3, %cst [2] : vector<2x4x16xf32> to vector<2x4xf32>
    %cst_4 = arith.constant 1.000000e-24 : f32
    %5 = vector.broadcast %cst_4 : f32 to vector<2x4xf32>
    %6 = arith.maximumf %4, %5 : vector<2x4xf32>
    %7 = math.rsqrt %6 : vector<2x4xf32>
    %c0_5 = arith.constant 0 : index
    %c0_6 = arith.constant 0 : index
    %c0_7 = arith.constant 0 : index
    %8 = vector.load %arg2[%c0_5, %c0_6, %c0_7] : memref<2x16x64xbf16, #tpu.memory_space<vmem>>, vector<2x16x64xbf16>
    %9 = arith.extf %8 : vector<2x16x64xbf16> to vector<2x16x64xf32>
    %10 = vector.extract_strided_slice %1 {offsets = [0, 0, 0], sizes = [2, 1, 16], strides = [1, 1, 1]} : vector<2x4x16xf32> to vector<2x1x16xf32>
    %11 = vector.shape_cast %10 : vector<2x1x16xf32> to vector<2x16xf32>
    %12 = vector.shape_cast %11 : vector<2x16xf32> to vector<2x16x1xf32>
    %13 = vector.broadcast %12 : vector<2x16x1xf32> to vector<2x16x64xf32>
    %14 = arith.mulf %13, %9 : vector<2x16x64xf32>
    %cst_8 = arith.constant dense<0.000000e+00> : vector<2x64xf32>
    %15 = vector.multi_reduction <add>, %14, %cst_8 [1] : vector<2x16x64xf32> to vector<2x64xf32>
    %16 = arith.mulf %9, %9 : vector<2x16x64xf32>
    %cst_9 = arith.constant dense<0.000000e+00> : vector<2x64xf32>
    %17 = vector.multi_reduction <add>, %16, %cst_9 [1] : vector<2x16x64xf32> to vector<2x64xf32>
    %cst_10 = arith.constant 1.000000e-24 : f32
    %18 = vector.broadcast %cst_10 : f32 to vector<2x64xf32>
    %19 = arith.maximumf %17, %18 : vector<2x64xf32>
    %20 = math.rsqrt %19 : vector<2x64xf32>
    %21 = vector.extract_strided_slice %7 {offsets = [0, 0], sizes = [2, 1], strides = [1, 1]} : vector<2x4xf32> to vector<2x1xf32>
    %22 = vector.broadcast %21 : vector<2x1xf32> to vector<2x64xf32>
    %23 = arith.mulf %22, %20 : vector<2x64xf32>
    %24 = arith.mulf %15, %23 : vector<2x64xf32>
    %c0_i32 = arith.constant 0 : i32
    %25 = vector.broadcast %c0_i32 : i32 to vector<2x64xi32>
    %26 = arith.cmpi eq, %2, %25 : vector<2x64xi32>
    %27 = arith.extui %26 : vector<2x64xi1> to vector<2x64xi32>
    %28 = arith.sitofp %27 : vector<2x64xi32> to vector<2x64xf32>
    %cst_11 = arith.constant 2.000000e+00 : f32
    %29 = vector.broadcast %cst_11 : f32 to vector<2x64xf32>
    %30 = arith.mulf %29, %28 : vector<2x64xf32>
    %cst_12 = arith.constant 1.000000e+00 : f32
    %31 = vector.broadcast %cst_12 : f32 to vector<2x64xf32>
    %32 = arith.subf %30, %31 : vector<2x64xf32>
    %33 = arith.subf %24, %32 : vector<2x64xf32>
    %34 = arith.mulf %33, %33 : vector<2x64xf32>
    %cst_13 = arith.constant dense<0.000000e+00> : vector<2xf32>
    %35 = vector.multi_reduction <add>, %34, %cst_13 [1] : vector<2x64xf32> to vector<2xf32>
    %36 = vector.shape_cast %35 : vector<2xf32> to vector<2x1xf32>
    %cst_14 = arith.constant 1.562500e-02 : f32
    %37 = vector.broadcast %cst_14 : f32 to vector<2x1xf32>
    %38 = arith.mulf %36, %37 : vector<2x1xf32>
    %c0_15 = arith.constant 0 : index
    %c0_16 = arith.constant 0 : index
    %c0_17 = arith.constant 0 : index
    %39 = vector.load %arg3[%c0_15, %c0_16, %c0_17] : memref<2x16x64xbf16, #tpu.memory_space<vmem>>, vector<2x16x64xbf16>
    %40 = arith.extf %39 : vector<2x16x64xbf16> to vector<2x16x64xf32>
    %41 = vector.extract_strided_slice %1 {offsets = [0, 1, 0], sizes = [2, 1, 16], strides = [1, 1, 1]} : vector<2x4x16xf32> to vector<2x1x16xf32>
    %42 = vector.shape_cast %41 : vector<2x1x16xf32> to vector<2x16xf32>
    %43 = vector.shape_cast %42 : vector<2x16xf32> to vector<2x16x1xf32>
    %44 = vector.broadcast %43 : vector<2x16x1xf32> to vector<2x16x64xf32>
    %45 = arith.mulf %44, %40 : vector<2x16x64xf32>
    %cst_18 = arith.constant dense<0.000000e+00> : vector<2x64xf32>
    %46 = vector.multi_reduction <add>, %45, %cst_18 [1] : vector<2x16x64xf32> to vector<2x64xf32>
    %47 = arith.mulf %40, %40 : vector<2x16x64xf32>
    %cst_19 = arith.constant dense<0.000000e+00> : vector<2x64xf32>
    %48 = vector.multi_reduction <add>, %47, %cst_19 [1] : vector<2x16x64xf32> to vector<2x64xf32>
    %cst_20 = arith.constant 1.000000e-24 : f32
    %49 = vector.broadcast %cst_20 : f32 to vector<2x64xf32>
    %50 = arith.maximumf %48, %49 : vector<2x64xf32>
    %51 = math.rsqrt %50 : vector<2x64xf32>
    %52 = vector.extract_strided_slice %7 {offsets = [0, 1], sizes = [2, 1], strides = [1, 1]} : vector<2x4xf32> to vector<2x1xf32>
    %53 = vector.broadcast %52 : vector<2x1xf32> to vector<2x64xf32>
    %54 = arith.mulf %53, %51 : vector<2x64xf32>
    %55 = arith.mulf %46, %54 : vector<2x64xf32>
    %c1_i32 = arith.constant 1 : i32
    %56 = vector.broadcast %c1_i32 : i32 to vector<2x64xi32>
    %57 = arith.cmpi eq, %2, %56 : vector<2x64xi32>
    %58 = arith.extui %57 : vector<2x64xi1> to vector<2x64xi32>
    %59 = arith.sitofp %58 : vector<2x64xi32> to vector<2x64xf32>
    %cst_21 = arith.constant 2.000000e+00 : f32
    %60 = vector.broadcast %cst_21 : f32 to vector<2x64xf32>
    %61 = arith.mulf %60, %59 : vector<2x64xf32>
    %cst_22 = arith.constant 1.000000e+00 : f32
    %62 = vector.broadcast %cst_22 : f32 to vector<2x64xf32>
    %63 = arith.subf %61, %62 : vector<2x64xf32>
    %64 = arith.subf %55, %63 : vector<2x64xf32>
    %65 = arith.mulf %64, %64 : vector<2x64xf32>
    %cst_23 = arith.constant dense<0.000000e+00> : vector<2xf32>
    %66 = vector.multi_reduction <add>, %65, %cst_23 [1] : vector<2x64xf32> to vector<2xf32>
    %67 = vector.shape_cast %66 : vector<2xf32> to vector<2x1xf32>
    %cst_24 = arith.constant 1.562500e-02 : f32
    %68 = vector.broadcast %cst_24 : f32 to vector<2x1xf32>
    %69 = arith.mulf %67, %68 : vector<2x1xf32>
    %c0_25 = arith.constant 0 : index
    %c0_26 = arith.constant 0 : index
    %c0_27 = arith.constant 0 : index
    %70 = vector.load %arg4[%c0_25, %c0_26, %c0_27] : memref<2x16x64xbf16, #tpu.memory_space<vmem>>, vector<2x16x64xbf16>
    %71 = arith.extf %70 : vector<2x16x64xbf16> to vector<2x16x64xf32>
    %72 = vector.extract_strided_slice %1 {offsets = [0, 2, 0], sizes = [2, 1, 16], strides = [1, 1, 1]} : vector<2x4x16xf32> to vector<2x1x16xf32>
    %73 = vector.shape_cast %72 : vector<2x1x16xf32> to vector<2x16xf32>
    %74 = vector.shape_cast %73 : vector<2x16xf32> to vector<2x16x1xf32>
    %75 = vector.broadcast %74 : vector<2x16x1xf32> to vector<2x16x64xf32>
    %76 = arith.mulf %75, %71 : vector<2x16x64xf32>
    %cst_28 = arith.constant dense<0.000000e+00> : vector<2x64xf32>
    %77 = vector.multi_reduction <add>, %76, %cst_28 [1] : vector<2x16x64xf32> to vector<2x64xf32>
    %78 = arith.mulf %71, %71 : vector<2x16x64xf32>
    %cst_29 = arith.constant dense<0.000000e+00> : vector<2x64xf32>
    %79 = vector.multi_reduction <add>, %78, %cst_29 [1] : vector<2x16x64xf32> to vector<2x64xf32>
    %cst_30 = arith.constant 1.000000e-24 : f32
    %80 = vector.broadcast %cst_30 : f32 to vector<2x64xf32>
    %81 = arith.maximumf %79, %80 : vector<2x64xf32>
    %82 = math.rsqrt %81 : vector<2x64xf32>
    %83 = vector.extract_strided_slice %7 {offsets = [0, 2], sizes = [2, 1], strides = [1, 1]} : vector<2x4xf32> to vector<2x1xf32>
    %84 = vector.broadcast %83 : vector<2x1xf32> to vector<2x64xf32>
    %85 = arith.mulf %84, %82 : vector<2x64xf32>
    %86 = arith.mulf %77, %85 : vector<2x64xf32>
    %c2_i32 = arith.constant 2 : i32
    %87 = vector.broadcast %c2_i32 : i32 to vector<2x64xi32>
    %88 = arith.cmpi eq, %2, %87 : vector<2x64xi32>
    %89 = arith.extui %88 : vector<2x64xi1> to vector<2x64xi32>
    %90 = arith.sitofp %89 : vector<2x64xi32> to vector<2x64xf32>
    %cst_31 = arith.constant 2.000000e+00 : f32
    %91 = vector.broadcast %cst_31 : f32 to vector<2x64xf32>
    %92 = arith.mulf %91, %90 : vector<2x64xf32>
    %cst_32 = arith.constant 1.000000e+00 : f32
    %93 = vector.broadcast %cst_32 : f32 to vector<2x64xf32>
    %94 = arith.subf %92, %93 : vector<2x64xf32>
    %95 = arith.subf %86, %94 : vector<2x64xf32>
    %96 = arith.mulf %95, %95 : vector<2x64xf32>
    %cst_33 = arith.constant dense<0.000000e+00> : vector<2xf32>
    %97 = vector.multi_reduction <add>, %96, %cst_33 [1] : vector<2x64xf32> to vector<2xf32>
    %98 = vector.shape_cast %97 : vector<2xf32> to vector<2x1xf32>
    %cst_34 = arith.constant 1.562500e-02 : f32
    %99 = vector.broadcast %cst_34 : f32 to vector<2x1xf32>
    %100 = arith.mulf %98, %99 : vector<2x1xf32>
    %c0_35 = arith.constant 0 : index
    %c0_36 = arith.constant 0 : index
    %c0_37 = arith.constant 0 : index
    %101 = vector.load %arg5[%c0_35, %c0_36, %c0_37] : memref<2x16x64xbf16, #tpu.memory_space<vmem>>, vector<2x16x64xbf16>
    %102 = arith.extf %101 : vector<2x16x64xbf16> to vector<2x16x64xf32>
    %103 = vector.extract_strided_slice %1 {offsets = [0, 3, 0], sizes = [2, 1, 16], strides = [1, 1, 1]} : vector<2x4x16xf32> to vector<2x1x16xf32>
    %104 = vector.shape_cast %103 : vector<2x1x16xf32> to vector<2x16xf32>
    %105 = vector.shape_cast %104 : vector<2x16xf32> to vector<2x16x1xf32>
    %106 = vector.broadcast %105 : vector<2x16x1xf32> to vector<2x16x64xf32>
    %107 = arith.mulf %106, %102 : vector<2x16x64xf32>
    %cst_38 = arith.constant dense<0.000000e+00> : vector<2x64xf32>
    %108 = vector.multi_reduction <add>, %107, %cst_38 [1] : vector<2x16x64xf32> to vector<2x64xf32>
    %109 = arith.mulf %102, %102 : vector<2x16x64xf32>
    %cst_39 = arith.constant dense<0.000000e+00> : vector<2x64xf32>
    %110 = vector.multi_reduction <add>, %109, %cst_39 [1] : vector<2x16x64xf32> to vector<2x64xf32>
    %cst_40 = arith.constant 1.000000e-24 : f32
    %111 = vector.broadcast %cst_40 : f32 to vector<2x64xf32>
    %112 = arith.maximumf %110, %111 : vector<2x64xf32>
    %113 = math.rsqrt %112 : vector<2x64xf32>
    %114 = vector.extract_strided_slice %7 {offsets = [0, 3], sizes = [2, 1], strides = [1, 1]} : vector<2x4xf32> to vector<2x1xf32>
    %115 = vector.broadcast %114 : vector<2x1xf32> to vector<2x64xf32>
    %116 = arith.mulf %115, %113 : vector<2x64xf32>
    %117 = arith.mulf %108, %116 : vector<2x64xf32>
    %c3_i32 = arith.constant 3 : i32
    %118 = vector.broadcast %c3_i32 : i32 to vector<2x64xi32>
    %119 = arith.cmpi eq, %2, %118 : vector<2x64xi32>
    %120 = arith.extui %119 : vector<2x64xi1> to vector<2x64xi32>
    %121 = arith.sitofp %120 : vector<2x64xi32> to vector<2x64xf32>
    %cst_41 = arith.constant 2.000000e+00 : f32
    %122 = vector.broadcast %cst_41 : f32 to vector<2x64xf32>
    %123 = arith.mulf %122, %121 : vector<2x64xf32>
    %cst_42 = arith.constant 1.000000e+00 : f32
    %124 = vector.broadcast %cst_42 : f32 to vector<2x64xf32>
    %125 = arith.subf %123, %124 : vector<2x64xf32>
    %126 = arith.subf %117, %125 : vector<2x64xf32>
    %127 = arith.mulf %126, %126 : vector<2x64xf32>
    %cst_43 = arith.constant dense<0.000000e+00> : vector<2xf32>
    %128 = vector.multi_reduction <add>, %127, %cst_43 [1] : vector<2x64xf32> to vector<2xf32>
    %129 = vector.shape_cast %128 : vector<2xf32> to vector<2x1xf32>
    %cst_44 = arith.constant 1.562500e-02 : f32
    %130 = vector.broadcast %cst_44 : f32 to vector<2x1xf32>
    %131 = arith.mulf %129, %130 : vector<2x1xf32>
    %132 = tpu.concatenate %38, %69, %100, %131 in 1 : vector<2x1xf32>, vector<2x1xf32>, vector<2x1xf32>, vector<2x1xf32> -> vector<2x4xf32>
    %c0_45 = arith.constant 0 : index
    %c0_46 = arith.constant 0 : index
    %133 = vector.load %arg7[%c0_45, %c0_46] : memref<2x4xf32, #tpu.memory_space<vmem>>, vector<2x4xf32>
    tpu.vector_store %arg7[%c0_45, %c0_46], %132 {strides = array<i32>} : memref<2x4xf32, #tpu.memory_space<vmem>>, vector<2x4xf32>,
    return
  }
  func.func @transform_0(%arg0: i32) -> (i32, i32, i32) {
    %c0_i32 = arith.constant 0 : i32
    %c0_i32_0 = arith.constant 0 : i32
    %c0_i32_1 = arith.constant 0 : i32
    return %arg0, %c0_i32, %c0_i32_0 : i32, i32, i32
  }
  func.func @transform_1(%arg0: i32) -> (i32, i32, i32) {
    %c0_i32 = arith.constant 0 : i32
    %c0_i32_0 = arith.constant 0 : i32
    %c0_i32_1 = arith.constant 0 : i32
    return %arg0, %c0_i32, %c0_i32_0 : i32, i32, i32
  }
  func.func @transform_2(%arg0: i32) -> (i32, i32, i32) {
    %c0_i32 = arith.constant 0 : i32
    %c0_i32_0 = arith.constant 0 : i32
    %c0_i32_1 = arith.constant 0 : i32
    return %arg0, %c0_i32, %c0_i32_0 : i32, i32, i32
  }
  func.func @transform_3(%arg0: i32) -> (i32, i32, i32) {
    %c0_i32 = arith.constant 0 : i32
    %c0_i32_0 = arith.constant 0 : i32
    %c0_i32_1 = arith.constant 0 : i32
    return %arg0, %c0_i32, %c0_i32_0 : i32, i32, i32
  }
  func.func @transform_4(%arg0: i32) -> (i32, i32, i32) {
    %c0_i32 = arith.constant 0 : i32
    %c0_i32_0 = arith.constant 0 : i32
    %c0_i32_1 = arith.constant 0 : i32
    return %arg0, %c0_i32, %c0_i32_0 : i32, i32, i32
  }
  func.func @transform_5(%arg0: i32) -> (i32, i32) {
    %c0_i32 = arith.constant 0 : i32
    %c0_i32_0 = arith.constant 0 : i32
    return %arg0, %c0_i32 : i32, i32
  }
  func.func @transform_6(%arg0: i32) -> (i32, i32) {
    %c0_i32 = arith.constant 0 : i32
    %c0_i32_0 = arith.constant 0 : i32
    return %arg0, %c0_i32 : i32, i32
  }
}

</mosaic_0001>

<bundles_post_ra>
// kernel: tpu_custom_call.1
= control target key start
LH: loop header
LB: loop body
LE: loop exit
PB: predicated region body
PF: predicated region fallthrough
CT: control target
= control target key end

     0   :  { %11 = vsyncpa [#allocation3], 0  ;;  %s1122_s0 = inlined_call_operand.hbm [shape: bf16[2,4,16], index: 0, kind: input, shape index: {}]   ;;  %s1123_s1 = inlined_call_operand.hbm [shape: bf16[2,16,64], index: 1, kind: input, shape index: {}]   ;;  %s1124_s2 = inlined_call_operand.hbm [shape: bf16[2,16,64], index: 2, kind: input, shape index: {}]   ;;  %s1125_s3 = inlined_call_operand.hbm [shape: bf16[2,16,64], index: 3, kind: input, shape index: {}]   ;;  %s1126_s4 = inlined_call_operand.hbm [shape: bf16[2,16,64], index: 4, kind: input, shape index: {}]   ;;  %s1127_s5 = inlined_call_operand.vmem [shape: s32[2,64], index: 5, kind: input, shape index: {}]   ;;  %s1128_s6 = inlined_call_operand.hbm [shape: f32[2,4], index: 6, kind: output, shape index: {}]  }
   0x1   :  { %12 = vsyncpa [#allocation6], 0 }
   0x2   :  { %13 = vsyncpa [#allocation9], 0 }
   0x3   :  { %14 = vsyncpa [#allocation4], 0  ;;  %s801_s21 = smov [#allocation5]   ;;  %s661_s25 = scalar_lea.hbm %s1123_s1, 256 }
   0x4   :  { %s32_s22 = sshll.u32 %s801_s21, 4  ;;  %p662_p0 = scmp.ne.s32.totalorder %s1123_s1, %s661_s25  ;;  %s33_s22 = int_to_ptr.vmem [resolvable:$true] %s32_s22 }
   0x5   :  { %p665_p1 = scmp.lt.u32.totalorder %s661_s25, %s1123_s1 }
   0x7   :  { %p667_p2 = pnand %p665_p1, %p662_p0 }
   0x9   :  { %670 = shalt.err (!%p667_p2)
}
   0xa   :  { %s671_s30 = scalar_lea.vmem %s33_s22, 256  ;;  %p676_p4 = scmp.lt.s32.totalorder %s33_s22, %s33_s22 }
   0xb   :  { %p672_p3 = scmp.ne.s32.totalorder %s33_s22, %s671_s30  ;;  %p677_p5 = scmp.lt.s32.totalorder %s671_s30, %s671_s30 }
   0xd   :  { %p678_p6 = por %p677_p5, %p676_p4 }
   0xf   :  { %p679_p7 = pnand %p678_p6, %p672_p3 }
  0x11   :  { %682 = shalt.err (!%p679_p7)
}
  0x12   :  { %s802_s7 = smov 64   ;;  %s803_s8 = smov 4  }
  0x13   :  { %38 = dma.hbm_to_vmem [thread:$0]  %s1123_s1, 256, %s33_s22, [#allocation6], %s802_s7, %s802_s7, %s803_s8  }
  0x14   :  { %s804_s11 = smov [#allocation8]   ;;  %s805_s13 = smov [#allocation2]  }
  0x15   :  { %s56_s12 = sshll.u32 %s804_s11, 4  ;;  %s20_s14 = sshll.u32 %s805_s13, 4  ;;  %s57_s12 = int_to_ptr.vmem [resolvable:$true] %s56_s12  ;;  %s21_s14 = int_to_ptr.vmem [resolvable:$true] %s20_s14 }
  0x16   :  { %s683_s17 = scalar_lea.hbm %s1125_s3, 256 }
  0x17   :  { %p684_p8 = scmp.ne.s32.totalorder %s1125_s3, %s683_s17  ;;  %p687_p9 = scmp.lt.u32.totalorder %s683_s17, %s1125_s3 }
  0x19   :  { %p689_p10 = pnand %p687_p9, %p684_p8 }
  0x1b   :  { %692 = shalt.err (!%p689_p10)
}
  0x1c   :  { %s693_s1 = scalar_lea.vmem %s57_s12, 256  ;;  %p698_p12 = scmp.lt.s32.totalorder %s57_s12, %s57_s12 }
  0x1d   :  { %p694_p11 = scmp.ne.s32.totalorder %s57_s12, %s693_s1  ;;  %p699_p13 = scmp.lt.s32.totalorder %s693_s1, %s693_s1 }
  0x1f   :  { %p700_p0 = por %p699_p13, %p698_p12 }
  0x21   :  { %p701_p1 = pnand %p700_p0, %p694_p11 }
  0x23   :  { %704 = shalt.err (!%p701_p1)
}
  0x24   :  { %62 = dma.hbm_to_vmem [thread:$0]  %s1125_s3, 256, %s57_s12, [#allocation9], %s802_s7, %s802_s7, %s803_s8  }
  0x25   :  { %s705_s26 = scalar_lea.hbm %s1122_s0, 64 }
  0x26   :  { %p706_p2 = scmp.ne.s32.totalorder %s1122_s0, %s705_s26  ;;  %p709_p3 = scmp.lt.u32.totalorder %s705_s26, %s1122_s0 }
  0x28   :  { %p711_p4 = pnand %p709_p3, %p706_p2 }
  0x2a   :  { %714 = shalt.err (!%p711_p4)
}
  0x2b   :  { %s715_s9 = scalar_lea.vmem %s21_s14, 64  ;;  %p720_p6 = scmp.lt.s32.totalorder %s21_s14, %s21_s14 }
  0x2c   :  { %p716_p5 = scmp.ne.s32.totalorder %s21_s14, %s715_s9  ;;  %p721_p7 = scmp.lt.s32.totalorder %s715_s9, %s715_s9 }
  0x2e   :  { %p722_p8 = por %p721_p7, %p720_p6 }
  0x30   :  { %p723_p9 = pnand %p722_p8, %p716_p5 }
  0x32   :  { %726 = shalt.err (!%p723_p9)
}
  0x33   :  { %s806_s3 = smov 32   ;;  %s807_s10 = smov 2  }
  0x34   :  { %26 = dma.hbm_to_vmem [thread:$0]  %s1122_s0, 64, %s21_s14, [#allocation3], %s806_s3, %s806_s3, %s807_s10  }
  0x35   :  { %s808_s13 = smov [#allocation7]   ;;  %s809_s16 = smov [#allocation10]  }
  0x36   :  { %s44_s15 = sshll.u32 %s808_s13, 4  ;;  %s68_s17 = sshll.u32 %s809_s16, 4  ;;  %s45_s15 = int_to_ptr.vmem [resolvable:$true] %s44_s15  ;;  %s69_s17 = int_to_ptr.vmem [resolvable:$true] %s68_s17 }
  0x37   :  { %s727_s20 = scalar_lea.hbm %s1124_s2, 256 }
  0x38   :  { %p728_p10 = scmp.ne.s32.totalorder %s1124_s2, %s727_s20  ;;  %p731_p11 = scmp.lt.u32.totalorder %s727_s20, %s1124_s2 }
  0x3a   :  { %p733_p12 = pnand %p731_p11, %p728_p10 }
  0x3c   :  { %736 = shalt.err (!%p733_p12)
}
  0x3d   :  { %s737_s0 = scalar_lea.vmem %s45_s15, 256  ;;  %p742_p0 = scmp.lt.s32.totalorder %s45_s15, %s45_s15 }
  0x3e   :  { %p738_p13 = scmp.ne.s32.totalorder %s45_s15, %s737_s0  ;;  %p743_p1 = scmp.lt.s32.totalorder %s737_s0, %s737_s0 }
  0x40   :  { %p744_p2 = por %p743_p1, %p742_p0 }
  0x42   :  { %p745_p3 = pnand %p744_p2, %p738_p13 }
  0x44   :  { %748 = shalt.err (!%p745_p3)
}
  0x45   :  { %50 = dma.hbm_to_vmem [thread:$0]  %s1124_s2, 256, %s45_s15, [#allocation6], %s802_s7, %s802_s7, %s803_s8  }
  0x46   :  { %s749_s27 = scalar_lea.hbm %s1126_s4, 256 }
  0x47   :  { %p750_p4 = scmp.ne.s32.totalorder %s1126_s4, %s749_s27  ;;  %p753_p5 = scmp.lt.u32.totalorder %s749_s27, %s1126_s4 }
  0x49   :  { %p755_p6 = pnand %p753_p5, %p750_p4 }
  0x4b   :  { %758 = shalt.err (!%p755_p6)
}
  0x4c   :  { %s759_s3 = scalar_lea.vmem %s69_s17, 256  ;;  %p764_p8 = scmp.lt.s32.totalorder %s69_s17, %s69_s17 }
  0x4d   :  { %p760_p7 = scmp.ne.s32.totalorder %s69_s17, %s759_s3  ;;  %p765_p9 = scmp.lt.s32.totalorder %s759_s3, %s759_s3 }
  0x4f   :  { %p766_p10 = por %p765_p9, %p764_p8 }
  0x51   :  { %p767_p11 = pnand %p766_p10, %p760_p7 }
  0x53   :  { %770 = shalt.err (!%p767_p11)
}
  0x54   :  { %74 = dma.hbm_to_vmem [thread:$0]  %s1126_s4, 256, %s69_s17, [#allocation9], %s802_s7, %s802_s7, %s803_s8  }
  0x55   :  { %793 = dma.done.wait [#allocation3], 64  }
  0x56   :  { %794 = vsyncadd [#allocation3], 4294967232 }
  0x57   :  { %795 = dma.done.wait [#allocation6], 512  }
  0x58   :  { %796 = vsyncadd [#allocation6], 4294966784 }
  0x59   :  { %797 = dma.done.wait [#allocation9], 512  }
  0x5a   :  { %798 = vsyncadd [#allocation9], 4294966784  ;;  %v118_v0 = vlaneseq  ;;  %v93_v3 = vld [vmem:[#allocation2 + $0x2] sm:$0x3]  ;;  %v92_v4 = vld [vmem:[#allocation2] sm:$0x3] }
  0x5b   :  { %v95_v5 = vunpack.c.l.bf16 %v93_v3  ;;  %v94_v6 = vunpack.c.l.bf16 %v92_v4  ;;  %vm99_vm0 = vcmask 125952   ;;  %v628_v22 = vld [vmem:[#allocation8 + $0x8] sm:$0xff]   ;;  %v595_v24 = vld [vmem:[#allocation5] sm:$0xff]   ;;  %v627_v29 = vld [vmem:[#allocation7 + $0x8] sm:$0xff]   ;;  %vm144_vm1 = vcmask 523264  }
  0x5c   :  { %v119_v1 = vshrl.u32 %v118_v0, 7  ;;  %v626_v23 = vld [vmem:[#allocation5 + $0x8] sm:$0xff]   ;;  %v935_v25 = vunpack.c.l.bf16 %v628_v22  ;;  %v937_v26 = vunpack.c.h.bf16 %v628_v22  ;;  %v943_v30 = vunpack.c.l.bf16 %v595_v24  ;;  %v603_v50 = vld [vmem:[#allocation7] sm:$0xff]   ;;  %v629_v51 = vld [vmem:[#allocation10 + $0x8] sm:$0xff]  }
  0x5d   :  { %v98_v7 = vmul.f32 %v95_v5, %v95_v5  ;;  %v97_v9 = vmul.f32 %v94_v6, %v94_v6  ;;  %v939_v27 = vunpack.c.l.bf16 %v626_v23  ;;  %v941_v28 = vunpack.c.h.bf16 %v626_v23  ;;  %v611_v63 = vld [vmem:[#allocation8] sm:$0xff]   ;;  %v619_v0 = vld [vmem:[#allocation10] sm:$0xff]  }
  0x5e   :  { %v919_v2 = vsub.s32 0, %v119_v1  ;;  %v922_v11 = vsub.s32 1, %v119_v1  ;;  %v925_v14 = vsub.s32 2, %v119_v1  ;;  %v930_v18 = vsub.s32 3, %v119_v1 }
  0x5f   :  { %v103_v10 = vsel %vm99_vm0, %v98_v7, 0.0  ;;  %v100_v12 = vsel %vm99_vm0, %v97_v9, 0.0  ;;  %v945_v31 = vunpack.c.h.bf16 %v595_v24  ;;  %v165_v32 = vmul.f32 %v939_v27, %v939_v27 }
  0x60   :  { %v132_v8 = vrot.slane %v95_v5, %v919_v2  ;;  %104 = vadd.xlane.f32.xlu0 %v103_v10  ;;  %v247_v13 = vrot.slane %v95_v5, %v922_v11  ;;  %v359_v15 = vrot.slane %v95_v5, %v925_v14  ;;  %v121_v16 = vrot.slane %v94_v6, %v919_v2 }
  0x61   :  { %v236_v17 = vrot.slane %v94_v6, %v922_v11  ;;  %v471_v19 = vrot.slane %v95_v5, %v930_v18  ;;  %v348_v20 = vrot.slane %v94_v6, %v925_v14  ;;  %v460_v21 = vrot.slane %v94_v6, %v930_v18 }
  0x62   :  { %134 = vbcast.lane.b32.xlu1 %v132_v8, 256  ;;  %v166_v33 = vmul.f32 %v941_v28, %v941_v28  ;;  %v951_v34 = vunpack.c.h.bf16 %v627_v29  ;;  %v391_v35 = vmul.f32 %v935_v25, %v935_v25  ;;  %v392_v36 = vmul.f32 %v937_v26, %v937_v26 }
  0x63   :  { %v957_v37 = vunpack.c.l.bf16 %v627_v29  ;;  %v163_v38 = vmul.f32 %v943_v30, %v943_v30  ;;  %v164_v39 = vmul.f32 %v945_v31, %v945_v31  ;;  %v176_v40 = vsel %vm144_vm1, %v165_v32, 0.0 }
  0x64   :  { %101 = vadd.xlane.f32.xlu0 %v100_v12  ;;  %v177_v41 = vsel %vm144_vm1, %v166_v33, 0.0  ;;  %v280_v42 = vmul.f32 %v951_v34, %v951_v34  ;;  %v402_v43 = vsel %vm144_vm1, %v391_v35, 0.0  ;;  %v403_v44 = vsel %vm144_vm1, %v392_v36, 0.0 }
  0x65   :  { %v279_v45 = vmul.f32 %v957_v37, %v957_v37  ;;  %v167_v46 = vsel %vm144_vm1, %v163_v38, 0.0  ;;  %v168_v47 = vsel %vm144_vm1, %v164_v39, 0.0  ;;  %v178_v48 = vadd.f32 %v177_v41, %v176_v40 }
  0x66   :  { %138 = vbcast.lane.b32.xlu1 %v132_v8, 264  ;;  %v404_v49 = vadd.f32 %v403_v44, %v402_v43  ;;  %v291_v52 = vsel %vm144_vm1, %v280_v42, 0.0  ;;  %v169_v54 = vadd.f32 %v168_v47, %v167_v46  ;;  %v975_v55 = vunpack.c.l.bf16 %v603_v50 }
  0x67   :  { %v290_v53 = vsel %vm144_vm1, %v279_v45, 0.0  ;;  %v977_v56 = vunpack.c.h.bf16 %v603_v50  ;;  %v979_v57 = vunpack.c.l.bf16 %v629_v51  ;;  %v981_v58 = vunpack.c.h.bf16 %v629_v51 }
  0x68   :  { %v179_v59 = vrot.slane %v178_v48, 4  ;;  %v405_v60 = vrot.slane %v404_v49, 4  ;;  %v292_v61 = vadd.f32 %v291_v52, %v290_v53  ;;  %v170_v62 = vrot.slane %v169_v54, 4 }
  0x69   :  { %v277_v1 = vmul.f32 %v975_v55, %v975_v55  ;;  %v278_v3 = vmul.f32 %v977_v56, %v977_v56  ;;  %v503_v4 = vmul.f32 %v979_v57, %v979_v57  ;;  %v504_v5 = vmul.f32 %v981_v58, %v981_v58 }
  0x6a   :  { %253 = vbcast.lane.b32.xlu1 %v247_v13, 264  ;;  %v180_v6 = vadd.f32 %v179_v59, %v178_v48  ;;  %v406_v7 = vadd.f32 %v405_v60, %v404_v49  ;;  %v293_v8 = vrot.slane %v292_v61, 4  ;;  %v991_v9 = vunpack.c.l.bf16 %v611_v63 }
  0x6b   :  { %v993_v10 = vunpack.c.h.bf16 %v611_v63  ;;  %v995_v12 = vunpack.c.l.bf16 %v619_v0  ;;  %vm217_vm6 = vcmask 1041409   ;;  %vm220_vm7 = vcmask 517120  }
  0x6c   :  { %v181_v22 = vrot.slane %v180_v6, 2  ;;  %v407_v23 = vrot.slane %v406_v7, 2  ;;  %v294_v24 = vadd.f32 %v293_v8, %v292_v61  ;;  %v389_v29 = vmul.f32 %v991_v9, %v991_v9 }
  0x6d   :  { %v390_v32 = vmul.f32 %v993_v10, %v993_v10  ;;  %v501_v33 = vmul.f32 %v995_v12, %v995_v12  ;;  %vm561_vm8 = vcmask 7168   ;;  %vm563_vm9 = vcmask 15360  }
  0x6e   :  { %361 = vbcast.lane.b32.xlu1 %v359_v15, 256  ;;  %v182_v41 = vadd.f32 %v181_v22, %v180_v6  ;;  %v408_v42 = vadd.f32 %v407_v23, %v406_v7  ;;  %v295_v43 = vrot.slane %v294_v24, 2  ;;  %v393_v44 = vsel %vm144_vm1, %v389_v29, 0.0 }
  0x6f   :  { %v394_v45 = vsel %vm144_vm1, %v390_v32, 0.0  ;;  %v505_v46 = vsel %vm144_vm1, %v501_v33, 0.0  ;;  %vm565_vm10 = vcmask 23552   ;;  %vm567_vm11 = vcmask 25600  }
  0x70   :  { %v183_v52 = vrot.slane %v182_v41, 1  ;;  %v395_v53 = vadd.f32 %v394_v45, %v393_v44  ;;  %v409_v59 = vrot.slane %v408_v42, 1  ;;  %v296_v60 = vadd.f32 %v295_v43, %v294_v24  ;;  %v96_v44 = vld [vmem:[%s1127_s5] sm:$0x3]  ;;  %s811_s5 = smov [#allocation11]  }
  0x71   :  { %vm201_vm2 = vcmp.eq.s32.totalorder %v96_v44, 0  ;;  %vm427_vm3 = vcmp.eq.s32.totalorder %v96_v44, 2  ;;  %vm315_vm4 = vcmp.eq.s32.totalorder %v96_v44, 1  ;;  %vm539_vm5 = vcmp.eq.s32.totalorder %v96_v44, 3  ;;  %s575_s8 = sshll.u32 %s811_s5, 4  ;;  %s576_s8 = int_to_ptr.vmem [resolvable:$true] %s575_s8 }
  0x72   :  { %365 = vbcast.lane.b32.xlu1 %v359_v15, 264  ;;  %v396_v6 = vrot.slane %v395_v53, 4  ;;  %v410_v8 = vadd.f32 %v409_v59, %v408_v42  ;;  %s771_s11 = scalar_lea.vmem %s576_s8, 32  ;;  %p776_p13 = scmp.lt.s32.totalorder %s576_s8, %s576_s8 }
  0x73   :  { %p772_p12 = scmp.ne.s32.totalorder %s576_s8, %s771_s11  ;;  %p777_p0 = scmp.lt.s32.totalorder %s771_s11, %s771_s11 }
  0x75   :  { %p778_p1 = por %p777_p0, %p776_p13 }
  0x76   :  { %123 = vbcast.lane.b32.xlu1 %v121_v16, 256 }
  0x77   :  { %p779_p2 = pnand %p778_p1, %p772_p12 }
  0x7a   :  { %127 = vbcast.lane.b32.xlu1 %v121_v16, 264  ;;  %249 = vbcast.lane.b32.xlu0 %v247_v13, 256  ;;  %v997_v13 = vunpack.c.h.bf16 %v619_v0  ;;  %v171_v16 = vadd.f32 %v170_v62, %v169_v54 }
  0x7c   :  { %v502_v35 = vmul.f32 %v997_v13, %v997_v13  ;;  %v172_v38 = vrot.slane %v171_v16, 2 }
  0x7e   :  { %238 = vbcast.lane.b32.xlu1 %v236_v17, 256  ;;  %242 = vbcast.lane.b32.xlu0 %v236_v17, 264  ;;  %v281_v17 = vsel %vm144_vm1, %v277_v1, 0.0  ;;  %v506_v47 = vsel %vm144_vm1, %v502_v35, 0.0  ;;  %v173_v49 = vadd.f32 %v172_v38, %v171_v16  ;;  %v297_v16 = vrot.slane %v296_v60, 1 }
  0x7f   :  { %v507_v54 = vadd.f32 %v506_v47, %v505_v46 }
  0x80   :  { %v174_v62 = vrot.slane %v173_v49, 1  ;;  %v298_v33 = vadd.f32 %v297_v16, %v296_v60 }
  0x81   :  { %v508_v7 = vrot.slane %v507_v54, 4 }
  0x82   :  { %473 = vbcast.lane.b32.xlu1 %v471_v19, 256  ;;  %477 = vbcast.lane.b32.xlu0 %v471_v19, 264  ;;  %v282_v19 = vsel %vm144_vm1, %v278_v3, 0.0  ;;  %v300_v45 = vmax.f32 %v298_v33, 1e-24 }
  0x83   :  { %v283_v39 = vadd.f32 %v282_v19, %v281_v17  ;;  %v175_v19 = vadd.f32 %v174_v62, %v173_v49  ;;  %v509_v29 = vadd.f32 %v508_v7, %v507_v54 }
  0x85   :  { %v284_v50 = vrot.slane %v283_v39, 4  ;;  %v185_v38 = vmax.f32 %v175_v19, 1e-24 }
  0x86   :  { %350 = vbcast.lane.b32.xlu1 %v348_v20, 256  ;;  %354 = vbcast.lane.b32.xlu0 %v348_v20, 264  ;;  %v514_v20 = vsel %vm144_vm1, %v503_v4, 0.0  ;;  %v184_v4 = vadd.f32 %v183_v52, %v182_v41 }
  0x87   :  { %v285_v63 = vadd.f32 %v284_v50, %v283_v39 }
  0x8a   :  { %462 = vbcast.lane.b32.xlu1 %v460_v21, 256  ;;  %466 = vbcast.lane.b32.xlu0 %v460_v21, 264  ;;  %v515_v21 = vsel %vm144_vm1, %v504_v5, 0.0 }
  0x8b   :  { %v516_v40 = vadd.f32 %v515_v21, %v514_v20  ;;  %v286_v20 = vrot.slane %v285_v63, 2 }
  0x8d   :  { %v517_v51 = vrot.slane %v516_v40, 4  ;;  %v287_v39 = vadd.f32 %v286_v20, %v285_v63 }
  0x8f   :  { %v518_v0 = vadd.f32 %v517_v51, %v516_v40  ;;  %v288_v49 = vrot.slane %v287_v39, 1 }
  0x91   :  { %v519_v21 = vrot.slane %v518_v0, 2 }
  0x93   :  { %v520_v40 = vadd.f32 %v519_v21, %v518_v0  ;;  %v289_v0 = vadd.f32 %v288_v49, %v287_v39 }
  0x95   :  { %v521_v50 = vrot.slane %v520_v40, 1 }
  0xd4   :  { %v135_v15 = vpop.permute.xlu1 %134 }
  0xd5   :  { %v142_v1 = vmul.f32 %v939_v27, %v135_v15  ;;  %v186_v27 = vmax.f32 %v184_v4, 1e-24  ;;  %v397_v15 = vadd.f32 %v396_v6, %v395_v53  ;;  %v810_v4 = vmov 0.0  }
  0xd6   :  { %v590_v6 = vsel %vm427_vm3, 1.0, %v810_v4 }
  0xd7   :  { %v154_v22 = vsel %vm144_vm1, %v142_v1, 0.0  ;;  %641 = vrsqrt.f32 %v186_v27  ;;  %v398_v43 = vrot.slane %v397_v15, 2  ;;  %v430_v27 = vmul.f32 2.0, %v590_v6 }
  0xd8   :  { %v139_v36 = vpop.permute.xlu1 %138 }
  0xd9   :  { %v143_v3 = vmul.f32 %v941_v28, %v139_v36 }
  0xdb   :  { %v155_v23 = vsel %vm144_vm1, %v143_v3, 0.0 }
  0xdc   :  { %v1015_v48 = vpop.permute.xlu1 %253  ;;  %v156_v35 = vadd.f32 %v155_v23, %v154_v22 }
  0xdd   :  { %v258_v39 = vmul.f32 %v951_v34, %v1015_v48 }
  0xde   :  { %v157_v46 = vrot.slane %v156_v35, 4 }
  0xe0   :  { %v362_v61 = vpop.permute.xlu1 %361  ;;  %v158_v60 = vadd.f32 %v157_v46, %v156_v35 }
  0xe1   :  { %v369_v5 = vmul.f32 %v935_v25, %v362_v61  ;;  %v412_v25 = vmax.f32 %v410_v8, 1e-24  ;;  %v642_v19 = vpop.eup %641 }
  0xe2   :  { %v159_v20 = vrot.slane %v158_v60, 2 }
  0xe3   :  { %v380_v28 = vsel %vm144_vm1, %v369_v5, 0.0  ;;  %643 = vrsqrt.f32 %v412_v25  ;;  %v586_v5 = vsel %vm201_vm2, 1.0, %v810_v4  ;;  %v299_v25 = vmax.f32 %v289_v0, 1e-24 }
  0xe4   :  { %v366_v17 = vpop.permute.xlu1 %365  ;;  %645 = vrsqrt.f32 %v185_v38 }
  0xe5   :  { %v370_v24 = vmul.f32 %v937_v26, %v366_v17  ;;  %v510_v26 = vrot.slane %v509_v29, 2  ;;  %647 = vrsqrt.f32 %v300_v45  ;;  %v588_v17 = vsel %vm315_vm4, 1.0, %v810_v4 }
  0xe6   :  { %v318_v38 = vmul.f32 2.0, %v588_v17  ;;  %v592_v45 = vsel %vm539_vm5, 1.0, %v810_v4 }
  0xe7   :  { %v381_v32 = vsel %vm144_vm1, %v370_v24, 0.0  ;;  %v511_v54 = vadd.f32 %v510_v26, %v509_v29  ;;  %v204_v24 = vmul.f32 2.0, %v586_v5  ;;  %v1040_v26 = vadd.f32 -1.0, %v430_v27 }
  0xe8   :  { %v124_v36 = vpop.permute.xlu1 %123  ;;  %v382_v41 = vadd.f32 %v381_v32, %v380_v28 }
  0xe9   :  { %v140_v42 = vmul.f32 %v943_v30, %v124_v36  ;;  %v399_v30 = vadd.f32 %v398_v43, %v397_v15  ;;  %v512_v16 = vrot.slane %v511_v54, 1  ;;  %v1038_v43 = vadd.f32 -1.0, %v204_v24 }
  0xea   :  { %v383_v51 = vrot.slane %v382_v41, 4 }
  0xeb   :  { %v145_v52 = vsel %vm144_vm1, %v140_v42, 0.0  ;;  %v400_v8 = vrot.slane %v399_v30, 1  ;;  %v513_v36 = vadd.f32 %v512_v16, %v511_v54  ;;  %v542_v54 = vmul.f32 2.0, %v592_v45 }
  0xec   :  { %v128_v47 = vpop.permute.xlu1 %127  ;;  %v384_v1 = vadd.f32 %v383_v51, %v382_v41  ;;  %v160_v41 = vadd.f32 %v159_v20, %v158_v60  ;;  %v1046_v51 = vadd.f32 -1.0, %v318_v38 }
  0xed   :  { %v141_v53 = vmul.f32 %v945_v31, %v128_v47  ;;  %v105_v62 = vpop.xlane.xlu0 %104  ;;  %v522_v31 = vadd.f32 %v521_v50, %v520_v40  ;;  %v1032_v28 = vpop.eup %643  ;;  %v401_v35 = vadd.f32 %v400_v8, %v399_v30  ;;  %v523_v48 = vmax.f32 %v513_v36, 1e-24 }
  0xee   :  { %v107_v3 = vmax.f32 %v105_v62, 1e-24  ;;  %v385_v15 = vrot.slane %v384_v1, 2  ;;  %v1034_v32 = vpop.eup %645  ;;  %v321_v6 = vrot.slane %v1046_v51, 1  ;;  %v1061_v8 = vadd.f32 -1.0, %v542_v54 }
  0xef   :  { %v146_v59 = vsel %vm144_vm1, %v141_v53, 0.0  ;;  %v524_v33 = vmax.f32 %v522_v31, 1e-24  ;;  %v1042_v46 = vpop.eup %647  ;;  %v411_v34 = vmax.f32 %v401_v35, 1e-24 }
  0xf0   :  { %v147_v61 = vadd.f32 %v146_v59, %v145_v52  ;;  %v239_v63 = vpop.permute.xlu1 %238  ;;  %649 = vrsqrt.f32 %v107_v3  ;;  %v386_v44 = vadd.f32 %v385_v15, %v384_v1  ;;  %v269_v52 = vsel %vm144_vm1, %v258_v39, 0.0 }
  0xf1   :  { %v102_v22 = vpop.xlane.xlu0 %101  ;;  %v255_v49 = vmul.f32 %v975_v55, %v239_v63  ;;  %v161_v59 = vrot.slane %v160_v41, 1  ;;  %v433_v55 = vrot.slane %v1040_v26, 1 }
  0xf2   :  { %v148_v7 = vrot.slane %v147_v61, 4  ;;  %v106_v29 = vmax.f32 %v102_v22, 1e-24  ;;  %v387_v63 = vrot.slane %v386_v44, 1 }
  0xf3   :  { %v259_v0 = vsel %vm144_vm1, %v255_v49, 0.0  ;;  %v162_v16 = vadd.f32 %v161_v59, %v160_v41 }
  0xf4   :  { %v149_v21 = vadd.f32 %v148_v7, %v147_v61  ;;  %v474_v23 = vpop.permute.xlu1 %473  ;;  %651 = vrsqrt.f32 %v106_v29 }
  0xf5   :  { %v250_v42 = vpop.permute.xlu0 %249  ;;  %653 = vrsqrt.f32 %v299_v25  ;;  %v481_v3 = vmul.f32 %v979_v57, %v474_v23  ;;  %v388_v23 = vadd.f32 %v387_v63, %v386_v44 }
  0xf6   :  { %v150_v40 = vrot.slane %v149_v21, 2  ;;  %v257_v47 = vmul.f32 %v957_v37, %v250_v42  ;;  %655 = vrsqrt.f32 %v524_v33  ;;  %v207_v37 = vrot.slane %v1038_v43, 1 }
  0xf7   :  { %657 = vrsqrt.f32 %v411_v34  ;;  %v492_v24 = vsel %vm144_vm1, %v481_v3, 0.0 }
  0xf8   :  { %v351_v50 = vpop.permute.xlu1 %350  ;;  %v151_v53 = vadd.f32 %v150_v40, %v149_v21  ;;  %v268_v30 = vsel %vm144_vm1, %v257_v47, 0.0  ;;  %659 = vrsqrt.f32 %v523_v48 }
  0xf9   :  { %v270_v60 = vadd.f32 %v269_v52, %v268_v30  ;;  %v243_v61 = vpop.permute.xlu0 %242  ;;  %v367_v15 = vmul.f32 %v991_v9, %v351_v50 }
  0xfa   :  { %v1052_v62 = vpop.eup %649  ;;  %v256_v1 = vmul.f32 %v977_v56, %v243_v61  ;;  %v152_v7 = vrot.slane %v151_v53, 1 }
  0xfb   :  { %v271_v4 = vrot.slane %v270_v60, 4  ;;  %v196_v5 = vrot.slane %v1052_v62, %v919_v2  ;;  %v310_v40 = vrot.slane %v1052_v62, %v922_v11  ;;  %v422_v50 = vrot.slane %v1052_v62, %v925_v14 }
  0xfc   :  { %v260_v31 = vsel %vm144_vm1, %v256_v1, 0.0  ;;  %v463_v56 = vpop.permute.xlu1 %462  ;;  %v153_v38 = vadd.f32 %v152_v7, %v151_v53 }
  0xfd   :  { %v272_v17 = vadd.f32 %v271_v4, %v270_v60  ;;  %v261_v20 = vadd.f32 %v260_v31, %v259_v0  ;;  %v478_v21 = vpop.permute.xlu0 %477  ;;  %v198_v22 = vmul.f32 %v642_v19, %v196_v5  ;;  %v479_v39 = vmul.f32 %v995_v12, %v463_v56 }
  0xfe   :  { %v1063_v57 = vpop.eup %651  ;;  %v482_v27 = vmul.f32 %v981_v58, %v478_v21  ;;  %v312_v59 = vmul.f32 %v1042_v46, %v310_v40  ;;  %v424_v5 = vmul.f32 %v1032_v28, %v422_v50  ;;  %v534_v56 = vrot.slane %v1052_v62, %v930_v18 }
  0xff   :  { %v273_v29 = vrot.slane %v272_v17, 2  ;;  %v262_v25 = vrot.slane %v261_v20, 4  ;;  %v192_v33 = vrot.slane %v1063_v57, %v919_v2  ;;  %v200_v35 = vmul.f32 %v198_v22, %v162_v16  ;;  %v654_v36 = vpop.eup %653 }
 0x100   :  { %v493_v19 = vsel %vm144_vm1, %v482_v27, 0.0  ;;  %v656_v58 = vpop.eup %655  ;;  %v371_v2 = vsel %vm144_vm1, %v367_v15, 0.0  ;;  %v483_v30 = vsel %vm144_vm1, %v479_v39, 0.0  ;;  %v306_v4 = vrot.slane %v1063_v57, %v922_v11 }
 0x101   :  { %v274_v41 = vadd.f32 %v273_v29, %v272_v17  ;;  %v263_v9 = vadd.f32 %v262_v25, %v261_v20  ;;  %v494_v42 = vadd.f32 %v493_v19, %v492_v24  ;;  %v355_v45 = vpop.permute.xlu0 %354  ;;  %v197_v44 = vmul.f32 %v1034_v32, %v192_v33  ;;  %v658_v32 = vpop.eup %657 }
 0x102   :  { %v368_v47 = vmul.f32 %v993_v10, %v355_v45  ;;  %v211_v49 = vsub.f32 %v200_v35, %v207_v37  ;;  %v660_v0 = vpop.eup %659  ;;  %v311_v11 = vmul.f32 %v654_v36, %v306_v4  ;;  %v426_v15 = vmul.f32 %v424_v5, %v388_v23 }
 0x103   :  { %v275_v12 = vrot.slane %v274_v41, 1  ;;  %v264_v34 = vrot.slane %v263_v9, 2  ;;  %v495_v48 = vrot.slane %v494_v42, 4  ;;  %v199_v52 = vmul.f32 %v197_v44, %v153_v38 }
 0x104   :  { %v372_v53 = vsel %vm144_vm1, %v368_v47, 0.0  ;;  %v213_v54 = vmul.f32 %v211_v49, %v211_v49  ;;  %v536_v62 = vmul.f32 %v656_v58, %v534_v56  ;;  %v545_v44 = vrot.slane %v1061_v8, 1 }
 0x105   :  { %v276_v60 = vadd.f32 %v275_v12, %v274_v41  ;;  %v265_v61 = vadd.f32 %v264_v34, %v263_v9  ;;  %v496_v63 = vadd.f32 %v495_v48, %v494_v42  ;;  %v373_v10 = vadd.f32 %v372_v53, %v371_v2  ;;  %v467_v37 = vpop.permute.xlu0 %466 }
 0x106   :  { %v480_v1 = vmul.f32 %v997_v13, %v467_v37  ;;  %v210_v3 = vsub.f32 %v199_v52, %v1038_v43  ;;  %v216_v21 = vrot.slane %v213_v54, 7  ;;  %v418_v9 = vrot.slane %v1063_v57, %v925_v14 }
 0x107   :  { %v266_v7 = vrot.slane %v265_v61, 1  ;;  %v497_v31 = vrot.slane %v496_v63, 2  ;;  %v374_v16 = vrot.slane %v373_v10, 4  ;;  %v314_v46 = vmul.f32 %v312_v59, %v276_v60 }
 0x108   :  { %v484_v17 = vsel %vm144_vm1, %v480_v1, 0.0  ;;  %v212_v20 = vmul.f32 %v210_v3, %v210_v3  ;;  %v423_v50 = vmul.f32 %v658_v32, %v418_v9  ;;  %v530_v12 = vrot.slane %v1063_v57, %v930_v18 }
 0x109   :  { %v267_v22 = vadd.f32 %v266_v7, %v265_v61  ;;  %v498_v13 = vadd.f32 %v497_v31, %v496_v63  ;;  %v375_v24 = vadd.f32 %v374_v16, %v373_v10  ;;  %v485_v43 = vadd.f32 %v484_v17, %v483_v30 }
 0x10a   :  { %v218_v27 = vsel %vm217_vm6, %v216_v21, %v212_v20  ;;  %v325_v28 = vsub.f32 %v314_v46, %v321_v6  ;;  %v437_v6 = vsub.f32 %v426_v15, %v433_v55  ;;  %v535_v54 = vmul.f32 %v660_v0, %v530_v12 }
 0x10b   :  { %v499_v29 = vrot.slane %v498_v13, 1  ;;  %v376_v25 = vrot.slane %v375_v24, 2  ;;  %v486_v33 = vrot.slane %v485_v43, 4  ;;  %v221_v35 = vsel %vm220_vm7, %v218_v27, 0.0 }
 0x10c   :  { %222 = vadd.xlane.f32.xlu1 %v221_v35  ;;  %v313_v38 = vmul.f32 %v311_v11, %v267_v22  ;;  %v327_v19 = vmul.f32 %v325_v28, %v325_v28  ;;  %v439_v34 = vmul.f32 %v437_v6, %v437_v6 }
 0x10d   :  { %v500_v39 = vadd.f32 %v499_v29, %v498_v13  ;;  %v377_v40 = vadd.f32 %v376_v25, %v375_v24  ;;  %v487_v41 = vadd.f32 %v486_v33, %v485_v43 }
 0x10e   :  { %v324_v36 = vsub.f32 %v313_v38, %v1046_v51  ;;  %v330_v47 = vrot.slane %v327_v19, 7  ;;  %v442_v60 = vrot.slane %v439_v34, 7 }
 0x10f   :  { %v378_v23 = vrot.slane %v377_v40, 1  ;;  %v488_v42 = vrot.slane %v487_v41, 2  ;;  %v538_v45 = vmul.f32 %v536_v62, %v500_v39 }
 0x110   :  { %v326_v2 = vmul.f32 %v324_v36, %v324_v36 }
 0x111   :  { %v379_v49 = vadd.f32 %v378_v23, %v377_v40  ;;  %v489_v58 = vadd.f32 %v488_v42, %v487_v41  ;;  %v549_v52 = vsub.f32 %v538_v45, %v545_v44 }
 0x112   :  { %v331_v14 = vsel %vm217_vm6, %v330_v47, %v326_v2 }
 0x113   :  { %v490_v51 = vrot.slane %v489_v58, 1  ;;  %v333_v48 = vsel %vm220_vm7, %v331_v14, 0.0  ;;  %v425_v55 = vmul.f32 %v423_v50, %v379_v49  ;;  %v551_v32 = vmul.f32 %v549_v52, %v549_v52 }
 0x114   :  { %334 = vadd.xlane.f32.xlu0 %v333_v48 }
 0x115   :  { %v491_v53 = vadd.f32 %v490_v51, %v489_v58  ;;  %v436_v30 = vsub.f32 %v425_v55, %v1040_v26  ;;  %v554_v37 = vrot.slane %v551_v32, 7 }
 0x117   :  { %v438_v59 = vmul.f32 %v436_v30, %v436_v30  ;;  %v537_v61 = vmul.f32 %v535_v54, %v491_v53 }
 0x119   :  { %v443_v63 = vsel %vm217_vm6, %v442_v60, %v438_v59  ;;  %v548_v18 = vsub.f32 %v537_v61, %v1061_v8 }
 0x11a   :  { %v445_v57 = vsel %vm220_vm7, %v443_v63, 0.0 }
 0x11b   :  { %446 = vadd.xlane.f32.xlu0 %v445_v57  ;;  %v550_v10 = vmul.f32 %v548_v18, %v548_v18 }
 0x11d   :  { %v555_v1 = vsel %vm217_vm6, %v554_v37, %v550_v10 }
 0x11e   :  { %v557_v3 = vsel %vm220_vm7, %v555_v1, 0.0 }
 0x11f   :  { %558 = vadd.xlane.f32.xlu1 %v557_v3 }
 0x199   :  { %v223_v0 = vpop.xlane.xlu1 %222 }
 0x19a   :  { %v224_v31 = vmul.f32 0.015625, %v223_v0 }
 0x1a1   :  { %v335_v26 = vpop.xlane.xlu0 %334 }
 0x1a2   :  { %v336_v5 = vmul.f32 0.015625, %v335_v26 }
 0x1a4   :  { %v562_v16 = vsel %vm561_vm8, %v224_v31, %v336_v5 }
 0x1a8   :  { %v447_v4 = vpop.xlane.xlu0 %446 }
 0x1a9   :  { %v448_v7 = vmul.f32 0.015625, %v447_v4 }
 0x1ab   :  { %v564_v17 = vsel %vm563_vm9, %v562_v16, %v448_v7 }
 0x1ac   :  { %v559_v8 = vpop.xlane.xlu1 %558 }
 0x1ad   :  { %v560_v46 = vmul.f32 0.015625, %v559_v8 }
 0x1af   :  { %v566_v20 = vsel %vm565_vm10, %v564_v17, %v560_v46 }
 0x1b0   :  { %568 = vst.msk [vmem:[#allocation11] sm:$0x3] %vm567_vm11, %v566_v20 }
 0x1b1   :  { %782 = shalt.err (!%p779_p2)
}
 0x1b2   :  { %s783_s15 = scalar_lea.hbm %s1128_s6, 32 }
 0x1b3   :  { %p784_p3 = scmp.ne.s32.totalorder %s1128_s6, %s783_s15  ;;  %p787_p4 = scmp.lt.u32.totalorder %s783_s15, %s1128_s6 }
 0x1b5   :  { %p789_p5 = pnand %p787_p4, %p784_p3 }
 0x1b7   :  { %792 = shalt.err (!%p789_p5)
}
 0x1b8   :  { %578 = dma.vmem_to_hbm [thread:$0]  %s576_s8, 32, %s1128_s6, [#allocation4]  }
 0x1b9   :  { %799 = dma.done.wait [#allocation4], 32  }
 0x1ba   :  { %800 = vsyncadd [#allocation4], 4294967264 }
 0x1bb   :  { %582 = vsyncpa [#allocation3], 1 }
 0x1bc   :  { %583 = vsyncpa [#allocation6], 1 }
 0x1bd   :  { %584 = vsyncpa [#allocation9], 1 }
 0x1be   :  { %585 = vsyncpa [#allocation4], 1 }

</bundles_post_ra>
